<compile_context>
chip_gen: v7x
topology: tpu7x:2x2x1
jax: 0.10.0
libtpu: 0.0.40
codegen_flags: <defaults>
</compile_context>

<pallas_src>
import functools

import jax
import jax.numpy as jnp
from jax.experimental import pallas as pl
from jax.experimental.pallas import tpu as pltpu

ALPHA = 0.5
TEMPERATURE = 4.0
assert TEMPERATURE == 4.0  # the e1^4 squaring trick below relies on T == 4


def _distill_kernel(student_ref, teacher_ref, tgt_ref, part_ref, *, total_rows):
    i = pl.program_id(0)
    TB, C = student_ref.shape

    s = student_ref[...].astype(jnp.float32)   # (TB, C) student logits
    t = teacher_ref[...].astype(jnp.float32)   # (TB, C) teacher logits
    tgt = tgt_ref[...]                          # (TB, 1) int32 labels

    # Rows past the true batch size (only the last, partial tile). Garbage in the
    # padded rows stays row-confined (every reduction below is along axis=1) and is
    # discarded by the where(valid, ...) masks on the per-row results.
    row = jax.lax.broadcasted_iota(jnp.int32, (TB, 1), 0) + i * TB
    valid = row < total_rows                    # (TB, 1) bool

    inv_T = 1.0 / TEMPERATURE

    # ---- student stats: a single exp per element --------------------------------
    m_s = jnp.max(s, axis=1, keepdims=True)
    st = s * inv_T
    m_st = m_s * inv_T                          # max(s/T) == max(s)/T  (T > 0)
    e1 = jnp.exp(st - m_st)                     # exp((s - m_s)/T)
    sum_e1 = jnp.sum(e1, axis=1, keepdims=True)
    lse_st = jnp.log(sum_e1) + m_st             # logsumexp(s / T)

    # exp(s - m_s) = e1 ** T, T == 4 -> two VPU squarings instead of a second exp.
    e2 = e1 * e1
    e4 = e2 * e2
    sum_e4 = jnp.sum(e4, axis=1, keepdims=True)
    lse_s = jnp.log(sum_e4) + m_s               # logsumexp(s)

    # ---- hard loss partial: sum_rows [ logsumexp(s) - s[row, target] ] ----------
    col = jax.lax.broadcasted_iota(jnp.int32, (TB, C), 1)
    picked = jnp.sum(jnp.where(col == tgt, s, 0.0), axis=1, keepdims=True)
    hard_rows = lse_s - picked                                            # (TB, 1)
    hard_part = jnp.sum(jnp.where(valid, hard_rows, 0.0), keepdims=True)  # (1, 1)

    # ---- soft loss partial: sum_rows KL(softmax(t/T) || softmax(s/T)) -----------
    # KL row = sum_c e_tt*(tt - m_tt - log_ps) / denom - log(denom)
    # (no p_t / log_pt materialization, no (TB,C) reciprocal broadcast)
    log_ps = st - lse_st                        # log_softmax(s / T)
    tt = t * inv_T
    m_tt = jnp.max(tt, axis=1, keepdims=True)
    e_tt = jnp.exp(tt - m_tt)
    denom = jnp.sum(e_tt, axis=1, keepdims=True)
    log_denom = jnp.log(denom)
    kl_num = jnp.sum(e_tt * (tt - m_tt - log_ps), axis=1, keepdims=True)
    kl_rows = kl_num / denom - log_denom                                  # (TB, 1)
    soft_part = jnp.sum(jnp.where(valid, kl_rows, 0.0), keepdims=True)    # (1, 1)

    # ---- one lane-dense (1, 128) partial row: lane0=hard_sum, lane1=soft_sum ----
    lane = jax.lax.broadcasted_iota(jnp.int32, (1, 128), 1)
    part_ref[...] = (jnp.where(lane == 0, hard_part, 0.0)
                     + jnp.where(lane == 1, soft_part, 0.0))


def _vmem_capacity_bytes():
    """Per-core VMEM capacity; conservative 64 MiB fallback (v7x per-TC)."""
    default = 64 * 1024 * 1024
    try:
        info = pltpu.get_tpu_info()
    except Exception:
        return default
    cap = getattr(info, "vmem_capacity_bytes", None)
    if not cap:
        return default
    return int(cap)


def _vmem_plan():
    """(vmem_limit_bytes, batch-tile VMEM budget) derived from the chip generation."""
    cap = _vmem_capacity_bytes()                     # 128 MiB v5e/v6e, 64 MiB v7x
    limit = min((cap * 3) // 4, 96 * 1024 * 1024)    # 96 MiB v5e/v6e, 48 MiB v7x
    limit = max(limit, 32 * 1024 * 1024)
    budget = (limit * 3) // 4                        # headroom for output/overheads
    return limit, budget


def _pick_tb(B, C, isz_s, isz_t, budget_bytes):
    """Largest batch tile fitting the VMEM budget (DMA buffers + f32 intermediates)."""
    # Per batch row resident in VMEM at once:
    #   - 2 pipeline buffers per logit input, native dtype
    #   - ~5 live (TB, C) float32 intermediates in the kernel body
    per_row = 2 * C * (isz_s + isz_t) + 5 * 4 * C
    tb = budget_bytes // max(per_row, 1)
    tb = max(8, min(tb, 2048))
    tb = (tb // 8) * 8
    if tb >= B:
        tb = B                                   # full-dim block is always legal
    if B >= 16:
        # Keep >= 2 grid steps: enables DMA/compute overlap and lets v7x's two
        # TensorCores both take tiles on the "parallel" grid axis.
        half = (((B + 1) // 2) + 7) // 8 * 8
        tb = min(tb, max(8, half))
    return tb


def distillation_loss(student_outputs, teacher_outputs, targets, *, tb=None):
    """student/teacher: (B, C) logits (any float dtype); targets: (B,) int."""
    B, C = student_outputs.shape
    tgt2d = targets.astype(jnp.int32).reshape(B, 1)

    isz_s = jnp.dtype(student_outputs.dtype).itemsize
    isz_t = jnp.dtype(teacher_outputs.dtype).itemsize

    vmem_limit, tile_budget = _vmem_plan()
    if tb is None:
        tb = _pick_tb(B, C, isz_s, isz_t, tile_budget)
    num_tiles = pl.cdiv(B, tb)

    kernel = functools.partial(_distill_kernel, total_rows=B)

    cost = pl.CostEstimate(
        flops=12 * B * C,
        transcendentals=2 * B * C,   # 2 exps / element after the T=4 squaring trick
        bytes_accessed=B * C * (isz_s + isz_t) + B * 4 + num_tiles * 128 * 4,
    )

    partials = pl.pallas_call(
        kernel,
        out_shape=jax.ShapeDtypeStruct((num_tiles, 128), jnp.float32),
        grid=(num_tiles,),
        in_specs=[
            pl.BlockSpec((tb, C), lambda i: (i, 0)),   # student logits (native dtype)
            pl.BlockSpec((tb, C), lambda i: (i, 0)),   # teacher logits (native dtype)
            pl.BlockSpec((tb, 1), lambda i: (i, 0)),   # targets
        ],
        out_specs=pl.BlockSpec((1, 128), lambda i: (i, 0)),
        compiler_params=pltpu.CompilerParams(
            dimension_semantics=("parallel",),
            vmem_limit_bytes=vmem_limit,
        ),
        cost_estimate=cost,
    )(student_outputs, teacher_outputs, tgt2d)

    sums = jnp.sum(partials, axis=0)           # tiny reduction over tiles
    inv_b = 1.0 / B
    hard = sums[0] * inv_b
    soft = sums[1] * inv_b
    loss = (1.0 - ALPHA) * hard + ALPHA * soft * (TEMPERATURE ** 2)
    return loss, hard, soft


def _reference(student, teacher, targets):
    """Pure-JAX reference (mirrors the PyTorch module) for validation."""
    B, C = student.shape
    log_p = jax.nn.log_softmax(student.astype(jnp.float32), axis=1)
    hard = -jnp.mean(log_p[jnp.arange(B), targets])
    log_ss = jax.nn.log_softmax(student.astype(jnp.float32) / TEMPERATURE, axis=1)
    p_t = jax.nn.softmax(teacher.astype(jnp.float32) / TEMPERATURE, axis=1)
    soft = jnp.sum(p_t * (jnp.log(p_t) - log_ss)) / B
    loss = (1.0 - ALPHA) * hard + ALPHA * soft * TEMPERATURE ** 2
    return loss, hard, soft


if __name__ == "__main__":
    key = jax.random.PRNGKey(0)
    k1, k2, k3 = jax.random.split(key, 3)
    B, C = 8, 32  # batch of 8 examples, 32 classes
    student = jax.random.normal(k1, (B, C), dtype=jnp.float32)
    teacher = jax.random.normal(k2, (B, C), dtype=jnp.float32)
    targets = jax.random.randint(k3, (B,), 0, C, dtype=jnp.int32)

    loss, hard, soft = distillation_loss(student, teacher, targets)
    jax.block_until_ready((loss, hard, soft))

    ref_loss, ref_hard, ref_soft = _reference(student, teacher, targets)
    assert jnp.allclose(loss, ref_loss, rtol=1e-5, atol=1e-5)
    assert jnp.allclose(hard, ref_hard, rtol=1e-5, atol=1e-5)
    assert jnp.allclose(soft, ref_soft, rtol=1e-5, atol=1e-5)

    print("KERNEL_OK")
</pallas_src>

<mosaic_0001>
module attributes {stable_mosaic.version = 11 : i64} {
  func.func @_distill_kernel(%arg0: i32, %arg1: memref<8x32xf32, #tpu.memory_space<vmem>>, %arg2: memref<8x32xf32, #tpu.memory_space<vmem>>, %arg3: memref<8x1xi32, #tpu.memory_space<vmem>>, %arg4: memref<1x128xf32, #tpu.memory_space<vmem>>) attributes {dimension_semantics = [#tpu.dimension_semantics<parallel>], iteration_bounds = array<i64: 1>, scalar_prefetch = 0 : i64, scratch_operands = 0 : i64, tpu.core_type = #tpu.core_type<tc>, window_params = [{transform_indices = @transform_0, window_bounds = array<i64: 8, 32>}, {transform_indices = @transform_1, window_bounds = array<i64: 8, 32>}, {transform_indices = @transform_2, window_bounds = array<i64: 8, 1>}, {transform_indices = @transform_3, window_bounds = array<i64: 1, 128>}]} {
    %c0 = arith.constant 0 : index
    %c0_0 = arith.constant 0 : index
    %0 = vector.load %arg1[%c0, %c0_0] : memref<8x32xf32, #tpu.memory_space<vmem>>, vector<8x32xf32>
    %c0_1 = arith.constant 0 : index
    %c0_2 = arith.constant 0 : index
    %1 = vector.load %arg2[%c0_1, %c0_2] : memref<8x32xf32, #tpu.memory_space<vmem>>, vector<8x32xf32>
    %c0_3 = arith.constant 0 : index
    %c0_4 = arith.constant 0 : index
    %2 = vector.load %arg3[%c0_3, %c0_4] : memref<8x1xi32, #tpu.memory_space<vmem>>, vector<8x1xi32>
    %3 = tpu.iota {dimensions = array<i32: 0>} : vector<8x1xi32>
    %c8_i32 = arith.constant 8 : i32
    %4 = arith.muli %arg0, %c8_i32 : i32
    %5 = vector.broadcast %4 : i32 to vector<8x1xi32>
    %6 = arith.addi %3, %5 : vector<8x1xi32>
    %c8_i32_5 = arith.constant 8 : i32
    %7 = vector.broadcast %c8_i32_5 : i32 to vector<8x1xi32>
    %8 = arith.cmpi slt, %6, %7 : vector<8x1xi32>
    %cst = arith.constant dense<0xFF800000> : vector<8xf32>
    %9 = vector.multi_reduction <maximumf>, %0, %cst [1] : vector<8x32xf32> to vector<8xf32>
    %10 = vector.shape_cast %9 : vector<8xf32> to vector<8x1xf32>
    %cst_6 = arith.constant 2.500000e-01 : f32
    %11 = vector.broadcast %cst_6 : f32 to vector<8x32xf32>
    %12 = arith.mulf %0, %11 : vector<8x32xf32>
    %cst_7 = arith.constant 2.500000e-01 : f32
    %13 = vector.broadcast %cst_7 : f32 to vector<8x1xf32>
    %14 = arith.mulf %10, %13 : vector<8x1xf32>
    %15 = vector.broadcast %14 : vector<8x1xf32> to vector<8x32xf32>
    %16 = arith.subf %12, %15 : vector<8x32xf32>
    %17 = math.exp %16 : vector<8x32xf32>
    %cst_8 = arith.constant dense<0.000000e+00> : vector<8xf32>
    %18 = vector.multi_reduction <add>, %17, %cst_8 [1] : vector<8x32xf32> to vector<8xf32>
    %19 = vector.shape_cast %18 : vector<8xf32> to vector<8x1xf32>
    %20 = math.log %19 : vector<8x1xf32>
    %21 = arith.addf %20, %14 : vector<8x1xf32>
    %22 = arith.mulf %17, %17 : vector<8x32xf32>
    %23 = arith.mulf %22, %22 : vector<8x32xf32>
    %cst_9 = arith.constant dense<0.000000e+00> : vector<8xf32>
    %24 = vector.multi_reduction <add>, %23, %cst_9 [1] : vector<8x32xf32> to vector<8xf32>
    %25 = vector.shape_cast %24 : vector<8xf32> to vector<8x1xf32>
    %26 = math.log %25 : vector<8x1xf32>
    %27 = arith.addf %26, %10 : vector<8x1xf32>
    %28 = tpu.iota {dimensions = array<i32: 1>} : vector<8x32xi32>
    %29 = vector.broadcast %2 : vector<8x1xi32> to vector<8x32xi32>
    %30 = arith.cmpi eq, %28, %29 : vector<8x32xi32>
    %cst_10 = arith.constant 0.000000e+00 : f32
    %31 = vector.broadcast %cst_10 : f32 to vector<8x32xf32>
    %32 = arith.select %30, %0, %31 : vector<8x32xi1>, vector<8x32xf32>
    %cst_11 = arith.constant dense<0.000000e+00> : vector<8xf32>
    %33 = vector.multi_reduction <add>, %32, %cst_11 [1] : vector<8x32xf32> to vector<8xf32>
    %34 = vector.shape_cast %33 : vector<8xf32> to vector<8x1xf32>
    %35 = arith.subf %27, %34 : vector<8x1xf32>
    %cst_12 = arith.constant 0.000000e+00 : f32
    %36 = vector.broadcast %cst_12 : f32 to vector<8x1xf32>
    %37 = arith.select %8, %35, %36 : vector<8x1xi1>, vector<8x1xf32>
    %38 = vector.shape_cast %37 : vector<8x1xf32> to vector<1x8x1xf32>
    %cst_13 = arith.constant dense<0.000000e+00> : vector<1xf32>
    %39 = vector.multi_reduction <add>, %38, %cst_13 [1, 2] : vector<1x8x1xf32> to vector<1xf32>
    %40 = vector.shape_cast %39 : vector<1xf32> to vector<1x1x1xf32>
    %41 = vector.extract %40[0, 0, 0] : f32 from vector<1x1x1xf32>
    %42 = vector.broadcast %41 : f32 to vector<1x1xf32>
    %43 = vector.broadcast %21 : vector<8x1xf32> to vector<8x32xf32>
    %44 = arith.subf %12, %43 : vector<8x32xf32>
    %cst_14 = arith.constant 2.500000e-01 : f32
    %45 = vector.broadcast %cst_14 : f32 to vector<8x32xf32>
    %46 = arith.mulf %1, %45 : vector<8x32xf32>
    %cst_15 = arith.constant dense<0xFF800000> : vector<8xf32>
    %47 = vector.multi_reduction <maximumf>, %46, %cst_15 [1] : vector<8x32xf32> to vector<8xf32>
    %48 = vector.shape_cast %47 : vector<8xf32> to vector<8x1xf32>
    %49 = vector.broadcast %48 : vector<8x1xf32> to vector<8x32xf32>
    %50 = arith.subf %46, %49 : vector<8x32xf32>
    %51 = math.exp %50 : vector<8x32xf32>
    %cst_16 = arith.constant dense<0.000000e+00> : vector<8xf32>
    %52 = vector.multi_reduction <add>, %51, %cst_16 [1] : vector<8x32xf32> to vector<8xf32>
    %53 = vector.shape_cast %52 : vector<8xf32> to vector<8x1xf32>
    %54 = math.log %53 : vector<8x1xf32>
    %55 = vector.broadcast %48 : vector<8x1xf32> to vector<8x32xf32>
    %56 = arith.subf %46, %55 : vector<8x32xf32>
    %57 = arith.subf %56, %44 : vector<8x32xf32>
    %58 = arith.mulf %51, %57 : vector<8x32xf32>
    %cst_17 = arith.constant dense<0.000000e+00> : vector<8xf32>
    %59 = vector.multi_reduction <add>, %58, %cst_17 [1] : vector<8x32xf32> to vector<8xf32>
    %60 = vector.shape_cast %59 : vector<8xf32> to vector<8x1xf32>
    %61 = arith.divf %60, %53 : vector<8x1xf32>
    %62 = arith.subf %61, %54 : vector<8x1xf32>
    %cst_18 = arith.constant 0.000000e+00 : f32
    %63 = vector.broadcast %cst_18 : f32 to vector<8x1xf32>
    %64 = arith.select %8, %62, %63 : vector<8x1xi1>, vector<8x1xf32>
    %65 = vector.shape_cast %64 : vector<8x1xf32> to vector<1x8x1xf32>
    %cst_19 = arith.constant dense<0.000000e+00> : vector<1xf32>
    %66 = vector.multi_reduction <add>, %65, %cst_19 [1, 2] : vector<1x8x1xf32> to vector<1xf32>
    %67 = vector.shape_cast %66 : vector<1xf32> to vector<1x1x1xf32>
    %68 = vector.extract %67[0, 0, 0] : f32 from vector<1x1x1xf32>
    %69 = vector.broadcast %68 : f32 to vector<1x1xf32>
    %70 = tpu.iota {dimensions = array<i32: 1>} : vector<1x128xi32>
    %c0_i32 = arith.constant 0 : i32
    %71 = vector.broadcast %c0_i32 : i32 to vector<1x128xi32>
    %72 = arith.cmpi eq, %70, %71 : vector<1x128xi32>
    %cst_20 = arith.constant 0.000000e+00 : f32
    %73 = vector.shape_cast %42 : vector<1x1xf32> to vector<1x1xf32>
    %74 = vector.broadcast %73 : vector<1x1xf32> to vector<1x128xf32>
    %75 = vector.broadcast %cst_20 : f32 to vector<1x128xf32>
    %76 = arith.select %72, %74, %75 : vector<1x128xi1>, vector<1x128xf32>
    %c1_i32 = arith.constant 1 : i32
    %77 = vector.broadcast %c1_i32 : i32 to vector<1x128xi32>
    %78 = arith.cmpi eq, %70, %77 : vector<1x128xi32>
    %cst_21 = arith.constant 0.000000e+00 : f32
    %79 = vector.shape_cast %69 : vector<1x1xf32> to vector<1x1xf32>
    %80 = vector.broadcast %79 : vector<1x1xf32> to vector<1x128xf32>
    %81 = vector.broadcast %cst_21 : f32 to vector<1x128xf32>
    %82 = arith.select %78, %80, %81 : vector<1x128xi1>, vector<1x128xf32>
    %83 = arith.addf %76, %82 : vector<1x128xf32>
    %c0_22 = arith.constant 0 : index
    %c0_23 = arith.constant 0 : index
    %84 = vector.load %arg4[%c0_22, %c0_23] : memref<1x128xf32, #tpu.memory_space<vmem>>, vector<1x128xf32>
    tpu.vector_store %arg4[%c0_22, %c0_23], %83 {strides = array<i32>} : memref<1x128xf32, #tpu.memory_space<vmem>>, vector<1x128xf32>,
    return
  }
  func.func @transform_0(%arg0: i32) -> (i32, i32) {
    %c0_i32 = arith.constant 0 : i32
    %c0_i32_0 = arith.constant 0 : i32
    return %arg0, %c0_i32 : i32, i32
  }
  func.func @transform_1(%arg0: i32) -> (i32, i32) {
    %c0_i32 = arith.constant 0 : i32
    %c0_i32_0 = arith.constant 0 : i32
    return %arg0, %c0_i32 : i32, i32
  }
  func.func @transform_2(%arg0: i32) -> (i32, i32) {
    %c0_i32 = arith.constant 0 : i32
    %c0_i32_0 = arith.constant 0 : i32
    return %arg0, %c0_i32 : i32, i32
  }
  func.func @transform_3(%arg0: i32) -> (i32, i32) {
    %c0_i32 = arith.constant 0 : i32
    %c0_i32_0 = arith.constant 0 : i32
    return %arg0, %c0_i32 : i32, i32
  }
}

</mosaic_0001>

<bundles_post_ra>
// kernel: tpu_custom_call.1
= control target key start
LH: loop header
LB: loop body
LE: loop exit
PB: predicated region body
PF: predicated region fallthrough
CT: control target
= control target key end

     0   :  { %8 = vsyncpa [#allocation3], 0  ;;  %s266_s0 = inlined_call_operand.vmem [shape: f32[8,32], index: 0, kind: input, shape index: {}]   ;;  %s267_s1 = inlined_call_operand.hbm [shape: f32[8,32], index: 1, kind: input, shape index: {}]   ;;  %s268_s2 = inlined_call_operand.vmem [shape: s32[8,1], index: 2, kind: input, shape index: {}]   ;;  %s269_s3 = inlined_call_operand.hbm [shape: f32[1,128], index: 3, kind: output, shape index: {}]  }
   0x1   :  { %9 = vsyncpa [#allocation4], 0  ;;  %s206_s12 = smov [#allocation2]   ;;  %s158_s16 = scalar_lea.hbm %s267_s1, 128 }
   0x2   :  { %s18_s13 = sshll.u32 %s206_s12, 4  ;;  %p159_p0 = scmp.ne.s32.totalorder %s267_s1, %s158_s16  ;;  %s19_s13 = int_to_ptr.vmem [resolvable:$true] %s18_s13 }
   0x3   :  { %p162_p1 = scmp.lt.u32.totalorder %s158_s16, %s267_s1 }
   0x5   :  { %p164_p2 = pnand %p162_p1, %p159_p0 }
   0x7   :  { %167 = shalt.err (!%p164_p2)
}
   0x8   :  { %s168_s21 = scalar_lea.vmem %s19_s13, 128  ;;  %p173_p4 = scmp.lt.s32.totalorder %s19_s13, %s19_s13 }
   0x9   :  { %p169_p3 = scmp.ne.s32.totalorder %s19_s13, %s168_s21  ;;  %p174_p5 = scmp.lt.s32.totalorder %s168_s21, %s168_s21 }
   0xb   :  { %p175_p6 = por %p174_p5, %p173_p4 }
   0xd   :  { %p176_p7 = pnand %p175_p6, %p169_p3 }
   0xf   :  { %179 = shalt.err (!%p176_p7)
}
  0x10   :  { %21 = dma.hbm_to_vmem [thread:$0]  %s267_s1, 128, %s19_s13, [#allocation3]  }
  0x11   :  { %202 = dma.done.wait [#allocation3], 128  }
  0x12   :  { %203 = vsyncadd [#allocation3], 4294967168  ;;  %vm36_vm0 = vcmask 261120   ;;  %v27_v0 = vld [vmem:[%s266_s0] sm:$0xff]  ;;  %v207_v5 = vmov 0   ;;  %v59_v23 = vlaneseq  ;;  %vm71_vm2 = vcmask 7168  }
  0x13   :  { %v37_v1 = vsel %vm36_vm0, %v27_v0, -inf  ;;  %v28_v2 = vld [vmem:[#allocation2] sm:$0xff]  ;;  %144 = vset.pattern.permute.xlu1 %v207_v5  ;;  %145 = vset.pattern.permute.xlu0 %v207_v5  ;;  %v40_v6 = vmul.f32 0.25, %v27_v0  ;;  %s208_s27 = smov [#allocation5]  }
  0x14   :  { %38 = vmax.xlane.f32.xlu0 %v37_v1  ;;  %v83_v3 = vmul.f32 0.25, %v28_v2  ;;  %v29_v19 = vld [vmem:[%s268_s2] sm:$0xff]  ;;  %v60_v27 = vand.u32 127, %v59_v23  ;;  %s128_s28 = sshll.u32 %s208_s27, 4  ;;  %s129_s28 = int_to_ptr.vmem [resolvable:$true] %s128_s28 }
  0x15   :  { %s180_s29 = scalar_lea.vmem %s129_s28, 16  ;;  %s184_s30 = scalar_lea.vmem %s129_s28, 32 }
  0x16   :  { %v84_v4 = vsel %vm36_vm0, %v83_v3, -inf  ;;  %vm114_vm3 = vcmp.eq.s32.totalorder %v60_v27, 0  ;;  %vm117_vm4 = vcmp.eq.s32.totalorder %v60_v27, 1  ;;  %p181_p8 = scmp.ne.s32.totalorder %s129_s28, %s180_s29  ;;  %p185_p9 = scmp.lt.s32.totalorder %s129_s28, %s129_s28 }
  0x17   :  { %p186_p10 = scmp.lt.s32.totalorder %s184_s30, %s180_s29 }
  0x18   :  { %85 = vmax.xlane.f32.xlu0 %v84_v4 }
  0x19   :  { %p187_p11 = por %p186_p10, %p185_p9 }
  0x1b   :  { %p188_p12 = pnand %p187_p11, %p181_p8 }
  0xa1   :  { %v39_v7 = vpop.xlane.xlu0 %38 }
  0xa2   :  { %v41_v8 = vmul.f32 0.25, %v39_v7 }
  0xa4   :  { %v42_v9 = vsub.f32 %v40_v6, %v41_v8 }
  0xa5   :  { %v86_v16 = vpop.xlane.xlu0 %85 }
  0xa6   :  { %v43_v10 = vmul.f32 1.442695, %v42_v9  ;;  %v87_v17 = vsub.f32 %v83_v3, %v86_v16 }
  0xa8   :  { %146 = vpow2.f32 %v43_v10  ;;  %v88_v18 = vmul.f32 1.442695, %v87_v17 }
  0xaa   :  { %148 = vpow2.f32 %v88_v18 }
  0xb2   :  { %v147_v11 = vpop.eup %146 }
  0xb3   :  { %v45_v12 = vsel %vm36_vm0, %v147_v11, 0.0  ;;  %v51_v13 = vmul.f32 %v147_v11, %v147_v11 }
  0xb4   :  { %46 = vadd.xlane.f32.xlu1 %v45_v12  ;;  %v149_v20 = vpop.eup %148 }
  0xb5   :  { %v52_v14 = vmul.f32 %v51_v13, %v51_v13  ;;  %v90_v21 = vsel %vm36_vm0, %v149_v20, 0.0 }
  0xb7   :  { %v53_v15 = vsel %vm36_vm0, %v52_v14, 0.0 }
  0xb8   :  { %54 = vadd.xlane.f32.xlu0 %v53_v15 }
  0xbc   :  { %91 = vadd.xlane.f32.xlu0 %v90_v21 }
  0xc5   :  { %62 = vperm.xlu1 %144, %v29_v19  }
 0x141   :  { %v47_v22 = vpop.xlane.xlu1 %46 }
 0x142   :  { %150 = vlog2.f32 %v47_v22 }
 0x145   :  { %v63_v28 = vpop.permute.xlu1 %62  ;;  %v55_v35 = vpop.xlane.xlu0 %54 }
 0x146   :  { %vm64_vm1 = vcmp.eq.s32.totalorder %v60_v27, %v63_v28  ;;  %152 = vlog2.f32 %v55_v35 }
 0x147   :  { %v65_v32 = vsel %vm64_vm1, %v27_v0, 0.0 }
 0x148   :  { %v66_v34 = vsel %vm36_vm0, %v65_v32, 0.0 }
 0x149   :  { %v92_v36 = vpop.xlane.xlu0 %91 }
 0x14a   :  { %154 = vlog2.f32 %v92_v36 }
 0x14b   :  { %156 = vrcp.f32 %v92_v36 }
 0x14c   :  { %v151_v24 = vpop.eup %150 }
 0x14d   :  { %v49_v25 = vmul.f32 0.6931472, %v151_v24 }
 0x14f   :  { %v50_v26 = vadd.f32 %v49_v25, %v41_v8 }
 0x150   :  { %v153_v37 = vpop.eup %152 }
 0x151   :  { %v82_v29 = vsub.f32 %v40_v6, %v50_v26  ;;  %v57_v40 = vmul.f32 0.6931472, %v153_v37 }
 0x153   :  { %v95_v30 = vsub.f32 %v87_v17, %v82_v29  ;;  %v58_v44 = vadd.f32 %v57_v40, %v39_v7 }
 0x154   :  { %v155_v38 = vpop.eup %154 }
 0x155   :  { %v96_v31 = vmul.f32 %v149_v20, %v95_v30  ;;  %v157_v39 = vpop.eup %156  ;;  %v94_v41 = vmul.f32 0.6931472, %v155_v38 }
 0x157   :  { %v97_v33 = vsel %vm36_vm0, %v96_v31, 0.0 }
 0x158   :  { %98 = vadd.xlane.f32.xlu0 %v97_v33 }
 0x15c   :  { %67 = vadd.xlane.f32.xlu0 %v66_v34 }
 0x1e5   :  { %v99_v42 = vpop.xlane.xlu0 %98 }
 0x1e6   :  { %v101_v43 = vmul.f32 %v157_v39, %v99_v42 }
 0x1e8   :  { %v102_v45 = vsub.f32 %v101_v43, %v94_v41 }
 0x1e9   :  { %v68_v46 = vpop.xlane.xlu0 %67 }
 0x1ea   :  { %v69_v47 = vsub.f32 %v58_v44, %v68_v46  ;;  %v104_v48 = vsel %vm71_vm2, %v102_v45, 0.0 }
 0x1eb   :  { %105 = vadd.xlane.f32.xlu0 %v104_v48 }
 0x1ec   :  { %v72_v49 = vsel %vm71_vm2, %v69_v47, 0.0 }
 0x1ed   :  { %73 = vadd.xlane.f32.xlu1 %v72_v49 }
 0x278   :  { %v106_v50 = vpop.xlane.xlu0 %105 }
 0x279   :  { %v107_v51 = vrot.slane %v106_v50, 4 }
 0x27a   :  { %v74_v52 = vpop.xlane.xlu1 %73 }
 0x27b   :  { %v108_v53 = vadd.f32 %v107_v51, %v106_v50  ;;  %v75_v54 = vrot.slane %v74_v52, 4 }
 0x27d   :  { %v109_v55 = vrot.slane %v108_v53, 2  ;;  %v76_v56 = vadd.f32 %v75_v54, %v74_v52 }
 0x27f   :  { %v110_v57 = vadd.f32 %v109_v55, %v108_v53  ;;  %v77_v58 = vrot.slane %v76_v56, 2 }
 0x281   :  { %v78_v59 = vadd.f32 %v77_v58, %v76_v56  ;;  %v111_v60 = vrot.slane %v110_v57, 1 }
 0x283   :  { %v79_v61 = vrot.slane %v78_v59, 1  ;;  %v112_v63 = vadd.f32 %v111_v60, %v110_v57 }
 0x285   :  { %v80_v62 = vadd.f32 %v79_v61, %v78_v59 }
 0x287   :  { %137 = vpush %v80_v62 }
 0x288   :  { %139 = vpush %v112_v63 }
 0x2b8   :  { %s138_s2 = spop %137 }
 0x2b9   :  { %v115_v0 = vstv %s138_s2  ;;  %s140_s26 = spop %139 }
 0x2ba   :  { %v116_v1 = vsel %vm114_vm3, %v115_v0, 0.0  ;;  %v118_v2 = vstv %s140_s26 }
 0x2bb   :  { %v119_v3 = vsel %vm117_vm4, %v118_v2, 0.0 }
 0x2bc   :  { %v120_v4 = vadd.f32 %v119_v3, %v116_v1 }
 0x2be   :  { %121 = vst [vmem:[#allocation5] sm:$0x1] %v120_v4 }
 0x2bf   :  { %191 = shalt.err (!%p188_p12)
}
 0x2c0   :  { %s192_s6 = scalar_lea.hbm %s269_s3, 16 }
 0x2c1   :  { %p193_p13 = scmp.ne.s32.totalorder %s269_s3, %s192_s6  ;;  %p196_p0 = scmp.lt.u32.totalorder %s192_s6, %s269_s3 }
 0x2c3   :  { %p198_p1 = pnand %p196_p0, %p193_p13 }
 0x2c5   :  { %201 = shalt.err (!%p198_p1)
}
 0x2c6   :  { %131 = dma.vmem_to_hbm [thread:$0]  %s129_s28, 16, %s269_s3, [#allocation4]  }
 0x2c7   :  { %204 = dma.done.wait [#allocation4], 16  }
 0x2c8   :  { %205 = vsyncadd [#allocation4], 4294967280 }
 0x2c9   :  { %135 = vsyncpa [#allocation3], 1 }
 0x2ca   :  { %136 = vsyncpa [#allocation4], 1 }

</bundles_post_ra>
